<compile_context>
chip_gen: v7x
topology: tpu7x:2x2x1
jax: 0.10.0
libtpu: 0.0.40
codegen_flags: <defaults>
</compile_context>

<pallas_src>
import functools
import math

import jax
import jax.numpy as jnp
from jax import lax
from jax.experimental import pallas as pl
from jax.experimental.pallas import tpu as pltpu


# Contract the last axis of both operands: (tm, tk) x (tn, tk) -> (tm, tn).
_DN = (((1,), (1,)), ((), ()))


def _round_up(a, b):
    return (a + b - 1) // b * b


def _linear_kernel(*refs, quant, has_acc_scratch, compute_dtype):
    """Unified kernel body; Python flags are baked in at trace time."""
    if quant:
        if has_acc_scratch:
            x_ref, w_ref, s_ref, o_ref, acc_ref = refs
        else:
            x_ref, w_ref, s_ref, o_ref = refs
            acc_ref = o_ref                      # accumulate directly into fp32 output
    else:
        if has_acc_scratch:
            x_ref, w_ref, o_ref, acc_ref = refs
        else:
            x_ref, w_ref, o_ref = refs
            acc_ref = o_ref

    k = pl.program_id(2)

    @pl.when(k == 0)
    def _():
        acc_ref[...] = jnp.zeros_like(acc_ref)

    x = x_ref[...]
    w = w_ref[...]
    if compute_dtype is not None:
        # Quant path: int8 weights are exact in bf16; activations are truncated
        # to bf16 so the MXU runs bf16 x bf16 -> fp32 instead of multi-pass fp32.
        x = x.astype(compute_dtype)
        w = w.astype(compute_dtype)
    elif w.dtype != x.dtype:
        # Documented: W follows the activation dtype for the MXU dot.
        w = w.astype(x.dtype)

    acc_ref[...] += lax.dot_general(
        x, w, dimension_numbers=_DN, preferred_element_type=jnp.float32)

    if quant or has_acc_scratch:
        @pl.when(k == pl.num_programs(2) - 1)
        def _():
            res = acc_ref[...]
            if quant:
                # s_ref: (1, tn) lane-dense, broadcasts along sublanes.
                res = res * s_ref[...]
            o_ref[...] = res.astype(o_ref.dtype)


class PallasLinear:
    """Pallas TPU equivalent of the PyTorch `Linear` module (no bias)."""

    def __init__(self, weight, weight_scaler=None, *, quant=False,
                 tm=None, tn=512, tk=None, w_buffers=None,
                 vmem_budget_bytes=40 * 1024 * 1024):
        self.quant = bool(quant)
        self.w_buffers = w_buffers
        N, K = weight.shape
        self.N, self.K = N, K

        w_itemsize = jnp.dtype(weight.dtype).itemsize
        if tk is None:
            # Narrow weights (int8 / bf16) afford a longer K tile; a larger tk
            # also amortizes the per-k-step accumulator read-modify-write.
            tk = 2048 if w_itemsize <= 2 else 1024
        if tm is None:
            # Quant path: bias toward larger tm so the once-per-k-step int8->bf16
            # weight conversion (independent of tm) is amortized over more MXU work.
            tm = 1024 if self.quant else 512

        # Clamp to the problem while staying (8, 128)-aligned.
        tm = min(_round_up(tm, 8), 1 << 20)           # M unknown until call; clamp then
        tn = min(_round_up(tn, 128), _round_up(N, 128))
        tk = min(_round_up(tk, 128), _round_up(K, 128))

        # Budget the double-buffered working set (pessimistic fp32 activations /
        # output + fp32 acc scratch) so it fits v7x's 64 MiB VMEM with headroom.
        nb_w = w_buffers if w_buffers is not None else 2

        def _footprint(tm_, tn_, tk_):
            return (2 * tm_ * tk_ * 4                      # x blocks (double-buffered)
                    + nb_w * tn_ * tk_ * w_itemsize        # W blocks
                    + 2 * tm_ * tn_ * 4                    # output blocks
                    + tm_ * tn_ * 4                        # acc scratch (worst case)
                    + (2 * tn_ * 4 if self.quant else 0))  # scaler blocks

        while _footprint(tm, tn, tk) > vmem_budget_bytes:
            if tk >= 256 and (tk // 2) % 128 == 0:
                tk //= 2
            elif tn >= 256 and (tn // 2) % 128 == 0:
                tn //= 2
            elif tm >= 16 and (tm // 2) % 8 == 0:
                tm //= 2
            else:
                break

        Np, Kp = _round_up(N, tn), _round_up(K, tk)
        self.tm_default, self.tn, self.tk = tm, tn, tk
        self.Np, self.Kp = Np, Kp

        # Weight padding done ONCE here (hoisted out of the per-call hot path).
        w = weight
        if (Np, Kp) != (N, K):
            w = jnp.pad(w, ((0, Np - N), (0, Kp - K)))
        self.w_padded = w

        if self.quant:
            s = weight_scaler.reshape(1, N).astype(jnp.float32)
            if Np != N:
                s = jnp.pad(s, ((0, 0), (0, Np - N)))
            self.s_padded = s
        else:
            self.s_padded = None

    def __call__(self, x):
        *lead, K = x.shape
        assert K == self.K, (K, self.K)
        M = math.prod(lead) if lead else 1
        out_dtype = x.dtype
        x2 = x.reshape(M, K)

        tm = min(self.tm_default, _round_up(M, 8))
        tn, tk = self.tn, self.tk
        Np, Kp = self.Np, self.Kp
        Mp = _round_up(M, tm)

        if (Mp, Kp) != (M, K):
            x2 = jnp.pad(x2, ((0, Mp - M), (0, Kp - K)))

        grid_m, grid_k = Mp // tm, Kp // tk
        grid_n = Np // tn
        # v7x megacore: make sure the parallel axes expose >= 2 blocks so both
        # TensorCores get work (only reachable by shrinking tn for decode-ish M).
        while (grid_m * grid_n < 2 and tn > 128
               and (tn // 2) % 128 == 0 and Np % (tn // 2) == 0):
            tn //= 2
            grid_n = Np // tn
        grid = (grid_m, grid_n, grid_k)

        out_is_f32 = jnp.dtype(out_dtype) == jnp.dtype(jnp.float32)
        has_acc_scratch = not out_is_f32
        compute_dtype = jnp.bfloat16 if self.quant else None

        x_spec = pl.BlockSpec((tm, tk), lambda i, j, k: (i, k))
        if self.w_buffers is not None:
            w_spec = pl.BlockSpec((tn, tk), lambda i, j, k: (j, k),
                                  pipeline_mode=pl.Buffered(self.w_buffers))
        else:
            w_spec = pl.BlockSpec((tn, tk), lambda i, j, k: (j, k))
        o_spec = pl.BlockSpec((tm, tn), lambda i, j, k: (i, j))

        in_specs = [x_spec, w_spec]
        operands = [x2, self.w_padded]
        if self.quant:
            in_specs.append(pl.BlockSpec((1, tn), lambda i, j, k: (0, j)))
            operands.append(self.s_padded)

        scratch_shapes = []
        if has_acc_scratch:
            scratch_shapes.append(pltpu.VMEM((tm, tn), jnp.float32))

        x_itemsize = jnp.dtype(x2.dtype).itemsize
        w_itemsize = jnp.dtype(self.w_padded.dtype).itemsize
        out_itemsize = jnp.dtype(out_dtype).itemsize
        nb_w = self.w_buffers if self.w_buffers is not None else 2
        footprint = (2 * tm * tk * x_itemsize
                     + nb_w * tn * tk * w_itemsize
                     + 2 * tm * tn * out_itemsize
                     + (2 * tn * 4 if self.quant else 0)
                     + (tm * tn * 4 if has_acc_scratch else 0))
        vmem_limit = min(footprint + (8 << 20), 64 << 20)

        # bytes_accessed accounts for the re-reads implied by the tiling:
        # x is streamed once per N-block, W once per M-block.
        cost = pl.CostEstimate(
            flops=2 * M * self.N * K,
            transcendentals=0,
            bytes_accessed=(grid_n * Mp * Kp * x_itemsize
                            + grid_m * Np * Kp * w_itemsize
                            + Mp * Np * out_itemsize),
        )

        kernel = functools.partial(
            _linear_kernel, quant=self.quant,
            has_acc_scratch=has_acc_scratch, compute_dtype=compute_dtype)

        out = pl.pallas_call(
            kernel,
            out_shape=jax.ShapeDtypeStruct((Mp, Np), out_dtype),
            grid=grid,
            in_specs=in_specs,
            out_specs=o_spec,
            scratch_shapes=scratch_shapes,
            compiler_params=pltpu.CompilerParams(
                dimension_semantics=("parallel", "parallel", "arbitrary"),
                vmem_limit_bytes=vmem_limit),
            cost_estimate=cost,
        )(*operands)

        out = out[:M, :self.N]
        return out.reshape(*lead, self.N)


if __name__ == "__main__":
    key = jax.random.PRNGKey(0)
    k_x, k_w, k_wq, k_s = jax.random.split(key, 4)

    batch, seq = 2, 8
    in_features, out_features = 32, 64

    x = jax.random.normal(k_x, (batch, seq, in_features), dtype=jnp.float32)

    # --- non-quant path: fp32 weight [out, in] ---
    w_fp32 = jax.random.normal(
        k_w, (out_features, in_features), dtype=jnp.float32) * 0.1
    lin = PallasLinear(w_fp32, quant=False)
    y = jax.block_until_ready(lin(x))
    y_ref = jnp.einsum("bsk,nk->bsn", x, w_fp32)
    assert y.shape == (batch, seq, out_features)
    assert jnp.allclose(y, y_ref, atol=1e-4, rtol=1e-4), \
        float(jnp.max(jnp.abs(y - y_ref)))

    # --- quant path: int8 weight [out, in] + per-row fp32 scaler [out] ---
    w_int8 = jax.random.randint(
        k_wq, (out_features, in_features), -127, 127, dtype=jnp.int8)
    scaler = jax.random.uniform(
        k_s, (out_features,), dtype=jnp.float32, minval=0.01, maxval=0.1)
    qlin = PallasLinear(w_int8, weight_scaler=scaler, quant=True)
    yq = jax.block_until_ready(qlin(x))
    # The quant kernel runs the MXU dot in bf16 (int8 weights are exact in bf16;
    # the activations are truncated), so compare against a bf16-activation ref.
    x_bf = x.astype(jnp.bfloat16).astype(jnp.float32)
    w_deq = w_int8.astype(jnp.float32) * scaler[:, None]
    yq_ref = jnp.einsum("bsk,nk->bsn", x_bf, w_deq)
    assert yq.shape == (batch, seq, out_features)
    assert jnp.allclose(yq, yq_ref, atol=1e-3, rtol=1e-3), \
        float(jnp.max(jnp.abs(yq - yq_ref)))

    print("KERNEL_OK")
</pallas_src>

<mosaic_0001>
module attributes {stable_mosaic.version = 11 : i64} {
  func.func @_linear_kernel(%arg0: i32, %arg1: i32, %arg2: i32, %arg3: memref<16x128xf32, #tpu.memory_space<vmem>>, %arg4: memref<128x128xf32, #tpu.memory_space<vmem>>, %arg5: memref<16x128xf32, #tpu.memory_space<vmem>>) attributes {dimension_semantics = [#tpu.dimension_semantics<parallel>, #tpu.dimension_semantics<parallel>, #tpu.dimension_semantics<arbitrary>], iteration_bounds = array<i64: 1, 1, 1>, scalar_prefetch = 0 : i64, scratch_operands = 0 : i64, tpu.core_type = #tpu.core_type<tc>, window_params = [{transform_indices = @transform_0, window_bounds = array<i64: 16, 128>}, {transform_indices = @transform_1, window_bounds = array<i64: 128, 128>}, {transform_indices = @transform_2, window_bounds = array<i64: 16, 128>}]} {
    %c0_i32 = arith.constant 0 : i32
    %0 = arith.cmpi eq, %arg2, %c0_i32 : i32
    %1 = arith.extui %0 : i1 to i32
    %c0_i32_0 = arith.constant 0 : i32
    %2 = arith.cmpi ne, %1, %c0_i32_0 : i32
    scf.if %2 {
      %cst_8 = arith.constant 0.000000e+00 : f32
      %9 = vector.broadcast %cst_8 : f32 to vector<16x128xf32>
      %c0_9 = arith.constant 0 : index
      %c0_10 = arith.constant 0 : index
      %10 = vector.load %arg5[%c0_9, %c0_10] : memref<16x128xf32, #tpu.memory_space<vmem>>, vector<16x128xf32>
      tpu.vector_store %arg5[%c0_9, %c0_10], %9 {strides = array<i32>} : memref<16x128xf32, #tpu.memory_space<vmem>>, vector<16x128xf32>,
    } else {
    }
    %c0 = arith.constant 0 : index
    %c0_1 = arith.constant 0 : index
    %3 = vector.load %arg3[%c0, %c0_1] : memref<16x128xf32, #tpu.memory_space<vmem>>, vector<16x128xf32>
    %c0_2 = arith.constant 0 : index
    %c0_3 = arith.constant 0 : index
    %4 = vector.load %arg4[%c0_2, %c0_3] : memref<128x128xf32, #tpu.memory_space<vmem>>, vector<128x128xf32>
    %c0_4 = arith.constant 0 : index
    %c0_5 = arith.constant 0 : index
    %5 = vector.load %arg5[%c0_4, %c0_5] : memref<16x128xf32, #tpu.memory_space<vmem>>, vector<16x128xf32>
    %cst = arith.constant dense<0.000000e+00> : vector<16x128xf32>
    %6 = tpu.matmul %3, %4, %cst {dimension_numbers = #tpu.dot_dimension_numbers<[1], [1], [0], [0], [0, 0, 1, 0], [], []>} : vector<16x128xf32>, vector<128x128xf32>, vector<16x128xf32> -> vector<16x128xf32>
    %7 = arith.addf %5, %6 : vector<16x128xf32>
    %c0_6 = arith.constant 0 : index
    %c0_7 = arith.constant 0 : index
    %8 = vector.load %arg5[%c0_6, %c0_7] : memref<16x128xf32, #tpu.memory_space<vmem>>, vector<16x128xf32>
    tpu.vector_store %arg5[%c0_6, %c0_7], %7 {strides = array<i32>} : memref<16x128xf32, #tpu.memory_space<vmem>>, vector<16x128xf32>,
    return
  }
  func.func @transform_0(%arg0: i32, %arg1: i32, %arg2: i32) -> (i32, i32) {
    %c0_i32 = arith.constant 0 : i32
    return %arg0, %arg2 : i32, i32
  }
  func.func @transform_1(%arg0: i32, %arg1: i32, %arg2: i32) -> (i32, i32) {
    %c0_i32 = arith.constant 0 : i32
    return %arg1, %arg2 : i32, i32
  }
  func.func @transform_2(%arg0: i32, %arg1: i32, %arg2: i32) -> (i32, i32) {
    %c0_i32 = arith.constant 0 : i32
    return %arg0, %arg1 : i32, i32
  }
}

</mosaic_0001>

<bundles_post_ra>
// kernel: tpu_custom_call.1
= control target key start
LH: loop header
LB: loop body
LE: loop exit
PB: predicated region body
PF: predicated region fallthrough
CT: control target
= control target key end

     0   :  { %7 = vsyncpa [#allocation3], 0  ;;  %s391_s0 = inlined_call_operand.hbm [shape: f32[16,128], index: 0, kind: input, shape index: {}]   ;;  %s392_s1 = inlined_call_operand.hbm [shape: f32[128,128], index: 1, kind: input, shape index: {}]   ;;  %s393_s2 = inlined_call_operand.hbm [shape: f32[16,128], index: 2, kind: output, shape index: {}]  }
   0x1   :  { %8 = vsyncpa [#allocation6], 0 }
   0x2   :  { %9 = vsyncpa [#allocation4], 0  ;;  %s326_s9 = smov [#allocation2]   ;;  %s254_s13 = scalar_lea.hbm %s391_s0, 256 }
   0x3   :  { %s15_s10 = sshll.u32 %s326_s9, 4  ;;  %p255_p0 = scmp.ne.s32.totalorder %s391_s0, %s254_s13  ;;  %s16_s10 = int_to_ptr.vmem [resolvable:$true] %s15_s10 }
   0x4   :  { %p258_p1 = scmp.lt.u32.totalorder %s254_s13, %s391_s0 }
   0x6   :  { %p260_p2 = pnand %p258_p1, %p255_p0 }
   0x8   :  { %263 = shalt.err (!%p260_p2)
}
   0x9   :  { %s264_s18 = scalar_lea.vmem %s16_s10, 256  ;;  %p269_p4 = scmp.lt.s32.totalorder %s16_s10, %s16_s10 }
   0xa   :  { %p265_p3 = scmp.ne.s32.totalorder %s16_s10, %s264_s18  ;;  %p270_p5 = scmp.lt.s32.totalorder %s264_s18, %s264_s18 }
   0xc   :  { %p271_p6 = por %p270_p5, %p269_p4 }
   0xe   :  { %p272_p7 = pnand %p271_p6, %p265_p3 }
  0x10   :  { %275 = shalt.err (!%p272_p7)
}
  0x11   :  { %s327_s19 = smov 128   ;;  %s328_s20 = smov 8  }
  0x12   :  { %21 = dma.hbm_to_vmem [thread:$0]  %s391_s0, 256, %s16_s10, [#allocation3], %s327_s19, %s327_s19, %s328_s20  }
  0x13   :  { %s329_s23 = smov [#allocation5]   ;;  %s276_s27 = scalar_lea.hbm %s392_s1, 2048 }
  0x14   :  { %s27_s24 = sshll.u32 %s329_s23, 4  ;;  %p277_p8 = scmp.ne.s32.totalorder %s392_s1, %s276_s27  ;;  %s28_s24 = int_to_ptr.vmem [resolvable:$true] %s27_s24 }
  0x15   :  { %p280_p9 = scmp.lt.u32.totalorder %s276_s27, %s392_s1 }
  0x17   :  { %p282_p10 = pnand %p280_p9, %p277_p8 }
  0x19   :  { %285 = shalt.err (!%p282_p10)
}
  0x1a   :  { %s286_s4 = scalar_lea.vmem %s28_s24, 2048  ;;  %p291_p12 = scmp.lt.s32.totalorder %s28_s24, %s28_s24 }
  0x1b   :  { %p287_p11 = scmp.ne.s32.totalorder %s28_s24, %s286_s4  ;;  %p292_p13 = scmp.lt.s32.totalorder %s286_s4, %s286_s4 }
  0x1d   :  { %p293_p0 = por %p292_p13, %p291_p12 }
  0x1f   :  { %p294_p1 = pnand %p293_p0, %p287_p11 }
  0x21   :  { %297 = shalt.err (!%p294_p1)
}
  0x22   :  { %33 = dma.hbm_to_vmem [thread:$0]  %s392_s1, 2048, %s28_s24, [#allocation6], %s327_s19, %s327_s19, %s328_s20  }
  0x23   :  { %320 = dma.done.wait [#allocation3], 256  }
  0x24   :  { %321 = vsyncadd [#allocation3], 4294967040 }
  0x25   :  { %322 = dma.done.wait [#allocation6], 2048  }
  0x26   :  { %323 = vsyncadd [#allocation6], 4294965248  ;;  %v48_v0 = vld [vmem:[#allocation5] sm:$0xff]  ;;  %v49_v1 = vld [vmem:[#allocation5 + $0x8] sm:$0xff]  ;;  %s330_s1 = smov [#allocation7]  }
  0x27   :  { %v50_v2 = vld [vmem:[#allocation5 + $0x10] sm:$0xff]  ;;  %v216_v3 = vpack.c.bf16 %v49_v1, %v48_v0  ;;  %v51_v4 = vld [vmem:[#allocation5 + $0x18] sm:$0xff]  ;;  %v52_v7 = vld [vmem:[#allocation5 + $0x20] sm:$0xff]  ;;  %s150_s6 = sshll.u32 %s330_s1, 4  ;;  %s151_s6 = int_to_ptr.vmem [resolvable:$true] %s150_s6 }
  0x28   :  { %v220_v5 = vpack.c.bf16 %v51_v4, %v50_v2  ;;  %v46_v6 = vld [vmem:[#allocation2] sm:$0xff]  ;;  %v53_v8 = vld [vmem:[#allocation5 + $0x28] sm:$0xff]  ;;  %v55_v11 = vld [vmem:[#allocation5 + $0x38] sm:$0xff]  ;;  %s298_s7 = scalar_lea.vmem %s151_s6, 256  ;;  %p303_p3 = scmp.lt.s32.totalorder %s151_s6, %s151_s6 }
  0x29   :  { %217 = vmatprep.subr.bf16.mxu0 %v216_v3  ;;  %213 = vmatprep.mubr.f32.mxu0 %v46_v6  ;;  %v224_v9 = vpack.c.bf16 %v53_v8, %v52_v7  ;;  %v54_v10 = vld [vmem:[#allocation5 + $0x30] sm:$0xff]  ;;  %v56_v13 = vld [vmem:[#allocation5 + $0x40] sm:$0xff]  ;;  %v57_v14 = vld [vmem:[#allocation5 + $0x48] sm:$0xff]  ;;  %p299_p2 = scmp.ne.s32.totalorder %s151_s6, %s298_s7  ;;  %p304_p4 = scmp.lt.s32.totalorder %s298_s7, %s298_s7 }
  0x2a   :  { %219 = vmatpush3.bf16.xpose.msra.mxu0 %v216_v3  ;;  %v228_v12 = vpack.c.bf16 %v55_v11, %v54_v10  ;;  %v232_v15 = vpack.c.bf16 %v57_v14, %v56_v13  ;;  %v58_v16 = vld [vmem:[#allocation5 + $0x50] sm:$0xff]  ;;  %v59_v17 = vld [vmem:[#allocation5 + $0x58] sm:$0xff]  ;;  %v60_v19 = vld [vmem:[#allocation5 + $0x60] sm:$0xff] }
  0x2b   :  { %221 = vmatprep.subr.bf16.mxu0 %v220_v5  ;;  %v236_v18 = vpack.c.bf16 %v59_v17, %v58_v16  ;;  %v61_v20 = vld [vmem:[#allocation5 + $0x68] sm:$0xff]  ;;  %v62_v22 = vld [vmem:[#allocation5 + $0x70] sm:$0xff]  ;;  %v63_v23 = vld [vmem:[#allocation5 + $0x78] sm:$0xff]  ;;  %p305_p5 = por %p304_p4, %p303_p3 }
  0x2c   :  { %v240_v21 = vpack.c.bf16 %v61_v20, %v60_v19  ;;  %v244_v24 = vpack.c.bf16 %v63_v23, %v62_v22  ;;  %v47_v25 = vld [vmem:[#allocation2 + $0x8] sm:$0xff] }
  0x2d   :  { %p306_p6 = pnand %p305_p5, %p299_p2 }
  0x32   :  { %223 = vmatpush3.bf16.xpose.msra.mxu0 %v220_v5 }
  0x33   :  { %225 = vmatprep.subr.bf16.mxu0 %v224_v9 }
  0x3a   :  { %227 = vmatpush3.bf16.xpose.msra.mxu0 %v224_v9 }
  0x3b   :  { %229 = vmatprep.subr.bf16.mxu0 %v228_v12 }
  0x42   :  { %231 = vmatpush3.bf16.xpose.msra.mxu0 %v228_v12 }
  0x43   :  { %233 = vmatprep.subr.bf16.mxu0 %v232_v15 }
  0x4a   :  { %235 = vmatpush3.bf16.xpose.msra.mxu0 %v232_v15 }
  0x4b   :  { %237 = vmatprep.subr.bf16.mxu0 %v236_v18 }
  0x52   :  { %239 = vmatpush3.bf16.xpose.msra.mxu0 %v236_v18 }
  0x53   :  { %241 = vmatprep.subr.bf16.mxu0 %v240_v21 }
  0x5a   :  { %243 = vmatpush3.bf16.xpose.msra.mxu0 %v240_v21 }
  0x5b   :  { %245 = vmatprep.subr.bf16.mxu0 %v244_v24 }
  0x62   :  { %247 = vmatpush3.bf16.xpose.msra.mxu0 %v244_v24 }
  0x69   :  { %214 = vmatmul.mubr.f32.vlgmr.msra.gmra.mrb[0].mxu0 %v47_v25 }
 0x13c   :  { %v215_v26 = vpop.f32.mrb[0].mxu0 }
 0x13d   :  { %v132_v27 = vpop.f32.mrb[1].mxu0  ;;  %144 = vst [vmem:[#allocation7 + $0x8] sm:$0xff] %v215_v26 }
 0x13e   :  { %143 = vst [vmem:[#allocation7] sm:$0xff] %v132_v27 }
 0x13f   :  { %309 = shalt.err (!%p306_p6)
}
 0x140   :  { %s310_s10 = scalar_lea.hbm %s393_s2, 256 }
 0x141   :  { %p311_p7 = scmp.ne.s32.totalorder %s393_s2, %s310_s10  ;;  %p314_p8 = scmp.lt.u32.totalorder %s310_s10, %s393_s2 }
 0x143   :  { %p316_p9 = pnand %p314_p8, %p311_p7 }
 0x145   :  { %319 = shalt.err (!%p316_p9)
}
 0x146   :  { %156 = dma.vmem_to_hbm [thread:$0]  %s151_s6, 256, %s393_s2, [#allocation4], %s327_s19, %s327_s19, %s328_s20  }
 0x147   :  { %324 = dma.done.wait [#allocation4], 256  }
 0x148   :  { %325 = vsyncadd [#allocation4], 4294967040 }
 0x149   :  { %160 = vsyncpa [#allocation3], 1 }
 0x14a   :  { %161 = vsyncpa [#allocation6], 1 }
 0x14b   :  { %162 = vsyncpa [#allocation4], 1 }

</bundles_post_ra>
